<compile_context>
chip_gen: v6e
topology: v6e:2x2x1
jax: 0.10.0
libtpu: 0.0.40
codegen_flags: <defaults>
</compile_context>

<pallas_src>
import functools

import jax
import jax.numpy as jnp
from jax.experimental import pallas as pl
from jax.experimental.pallas import tpu as pltpu

NEURONES = 300   # hidden width from the PyTorch module
OUT_DIM = 3      # layer2 output features
LANE = 128       # TPU lane width
MAX_TB = 512     # batch tile rows (multiple of 8); ~1.3 MiB live per tile


def _round_up(n, m):
    return ((n + m - 1) // m) * m


def mlp_kernel(x_ref, w1t_ref, b1_ref, w2t_ref, b2_ref, o_ref):
    # ---- layer1: x @ W1^T + b1, done as two broadcast FMAs on the VPU ----
    # x_ref: (TB, 2), w1t_ref: (2, Hp), b1_ref: (1, Hp)
    x0 = x_ref[:, 0:1]                                   # (TB, 1)
    x1 = x_ref[:, 1:2]                                   # (TB, 1)
    h = x0 * w1t_ref[0:1, :] + x1 * w1t_ref[1:2, :] + b1_ref[...]   # (TB, Hp)
    h = jnp.maximum(h, 0.0)                              # ReLU (padded cols stay 0)
    # ---- layer2: h @ W2^T + b2 (lane-dense N=128 on the MXU) ----
    out = jnp.dot(h, w2t_ref[...], preferred_element_type=jnp.float32)
    out = out + b2_ref[...]                              # (TB, 128) + (1, 128)
    o_ref[...] = out.astype(o_ref.dtype)


@functools.partial(jax.jit, static_argnames=())
def net_forward(x, w1, b1, w2, b2):
    """Pallas TPU forward of Net.

    x : (B, 2) float32
    w1: (H, 2), b1: (H,)   -- PyTorch layout (out_features, in_features)
    w2: (3, H), b2: (3,)
    returns (B, 3) float32
    """
    B = x.shape[0]
    H = w1.shape[0]

    # --- pad hidden width to a lane multiple; pad output width to 128 lanes ---
    Hp = _round_up(H, LANE)                      # 300 -> 384
    Np = LANE                                    # 3   -> 128

    w1t = jnp.zeros((2, Hp), jnp.float32).at[:, :H].set(w1.T)          # (2, Hp)
    b1p = jnp.zeros((1, Hp), jnp.float32).at[:, :H].set(b1[None, :])   # (1, Hp)
    w2t = jnp.zeros((Hp, Np), jnp.float32).at[:H, :OUT_DIM].set(w2.T)  # (Hp, Np)
    b2p = jnp.zeros((1, Np), jnp.float32).at[:, :OUT_DIM].set(b2[None, :])

    # --- batch tiling: TB multiple of 8, pad B up so every tile is full ---
    if B <= MAX_TB:
        TB = _round_up(max(B, 1), 8)
    else:
        TB = MAX_TB
    Bp = _round_up(B, TB)
    x_p = jnp.zeros((Bp, 2), jnp.float32).at[:B, :].set(x)

    grid = (Bp // TB,)
    out_padded = pl.pallas_call(
        mlp_kernel,
        out_shape=jax.ShapeDtypeStruct((Bp, Np), jnp.float32),
        grid=grid,
        in_specs=[
            pl.BlockSpec((TB, 2), lambda i: (i, 0)),     # x tile (streams)
            pl.BlockSpec((2, Hp), lambda i: (0, 0)),     # W1^T   (resident)
            pl.BlockSpec((1, Hp), lambda i: (0, 0)),     # b1     (resident)
            pl.BlockSpec((Hp, Np), lambda i: (0, 0)),    # W2^T   (resident)
            pl.BlockSpec((1, Np), lambda i: (0, 0)),     # b2     (resident)
        ],
        out_specs=pl.BlockSpec((TB, Np), lambda i: (i, 0)),  # lane-dense out tile
        compiler_params=pltpu.CompilerParams(
            dimension_semantics=("parallel",),
        ),
    )(x_p, w1t, b1p, w2t, b2p)

    return out_padded[:B, :OUT_DIM]


def init_params(key, neurones=NEURONES):
    """Deterministic init mimicking torch.nn.Linear default U(-1/sqrt(fan_in), +)."""
    k1, k2, k3, k4 = jax.random.split(key, 4)
    bound1 = 1.0 / jnp.sqrt(2.0)
    bound2 = 1.0 / jnp.sqrt(float(neurones))
    w1 = jax.random.uniform(k1, (neurones, 2), jnp.float32, -bound1, bound1)
    b1 = jax.random.uniform(k2, (neurones,), jnp.float32, -bound1, bound1)
    w2 = jax.random.uniform(k3, (3, neurones), jnp.float32, -bound2, bound2)
    b2 = jax.random.uniform(k4, (3,), jnp.float32, -bound2, bound2)
    return w1, b1, w2, b2


if __name__ == "__main__":
    key = jax.random.PRNGKey(0)
    kx, kp = jax.random.split(key)

    B = 8
    x = jax.random.normal(kx, (B, 2), jnp.float32)
    w1, b1, w2, b2 = init_params(kp)

    out = net_forward(x, w1, b1, w2, b2)
    out = jax.block_until_ready(out)

    # Reference check in plain JAX (same math as the PyTorch module).
    ref = jnp.maximum(x @ w1.T + b1, 0.0) @ w2.T + b2
    assert out.shape == (B, OUT_DIM)
    assert jnp.allclose(out, ref, atol=1e-5, rtol=1e-5)

    # Also check a non-multiple-of-tile batch to exercise padding paths.
    B2 = 1234
    x2 = jax.random.normal(jax.random.PRNGKey(7), (B2, 2), jnp.float32)
    out2 = jax.block_until_ready(net_forward(x2, w1, b1, w2, b2))
    ref2 = jnp.maximum(x2 @ w1.T + b1, 0.0) @ w2.T + b2
    assert out2.shape == (B2, OUT_DIM)
    assert jnp.allclose(out2, ref2, atol=1e-4, rtol=1e-4)

    print("KERNEL_OK")
</pallas_src>

<mosaic_0001>
module attributes {stable_mosaic.version = 11 : i64} {
  func.func @mlp_kernel(%arg0: i32, %arg1: memref<8x2xf32, #tpu.memory_space<vmem>>, %arg2: memref<2x384xf32, #tpu.memory_space<vmem>>, %arg3: memref<1x384xf32, #tpu.memory_space<vmem>>, %arg4: memref<384x128xf32, #tpu.memory_space<vmem>>, %arg5: memref<1x128xf32, #tpu.memory_space<vmem>>, %arg6: memref<8x128xf32, #tpu.memory_space<vmem>>) attributes {dimension_semantics = [#tpu.dimension_semantics<parallel>], iteration_bounds = array<i64: 1>, scalar_prefetch = 0 : i64, scratch_operands = 0 : i64, tpu.core_type = #tpu.core_type<tc>, window_params = [{transform_indices = @transform_0, window_bounds = array<i64: 8, 2>}, {pipeline_mode = #tpu.pipeline_mode<synchronous>, transform_indices = @transform_1, window_bounds = array<i64: 2, 384>}, {pipeline_mode = #tpu.pipeline_mode<synchronous>, transform_indices = @transform_2, window_bounds = array<i64: 1, 384>}, {pipeline_mode = #tpu.pipeline_mode<synchronous>, transform_indices = @transform_3, window_bounds = array<i64: 384, 128>}, {pipeline_mode = #tpu.pipeline_mode<synchronous>, transform_indices = @transform_4, window_bounds = array<i64: 1, 128>}, {transform_indices = @transform_5, window_bounds = array<i64: 8, 128>}]} {
    %c0 = arith.constant 0 : index
    %c0_0 = arith.constant 0 : index
    %0 = vector.load %arg1[%c0, %c0_0] : memref<8x2xf32, #tpu.memory_space<vmem>>, vector<8x1xf32>
    %c0_1 = arith.constant 0 : index
    %c1 = arith.constant 1 : index
    %1 = vector.load %arg1[%c0_1, %c1] : memref<8x2xf32, #tpu.memory_space<vmem>>, vector<8x1xf32>
    %c0_2 = arith.constant 0 : index
    %c0_3 = arith.constant 0 : index
    %2 = vector.load %arg2[%c0_2, %c0_3] : memref<2x384xf32, #tpu.memory_space<vmem>>, vector<1x384xf32>
    %3 = vector.broadcast %0 : vector<8x1xf32> to vector<8x384xf32>
    %4 = vector.broadcast %2 : vector<1x384xf32> to vector<8x384xf32>
    %5 = arith.mulf %3, %4 : vector<8x384xf32>
    %c1_4 = arith.constant 1 : index
    %c0_5 = arith.constant 0 : index
    %6 = vector.load %arg2[%c1_4, %c0_5] : memref<2x384xf32, #tpu.memory_space<vmem>>, vector<1x384xf32>
    %7 = vector.broadcast %1 : vector<8x1xf32> to vector<8x384xf32>
    %8 = vector.broadcast %6 : vector<1x384xf32> to vector<8x384xf32>
    %9 = arith.mulf %7, %8 : vector<8x384xf32>
    %10 = arith.addf %5, %9 : vector<8x384xf32>
    %c0_6 = arith.constant 0 : index
    %c0_7 = arith.constant 0 : index
    %11 = vector.load %arg3[%c0_6, %c0_7] : memref<1x384xf32, #tpu.memory_space<vmem>>, vector<1x384xf32>
    %12 = vector.broadcast %11 : vector<1x384xf32> to vector<8x384xf32>
    %13 = arith.addf %10, %12 : vector<8x384xf32>
    %cst = arith.constant 0.000000e+00 : f32
    %14 = vector.broadcast %cst : f32 to vector<8x384xf32>
    %15 = arith.maximumf %13, %14 : vector<8x384xf32>
    %c0_8 = arith.constant 0 : index
    %c0_9 = arith.constant 0 : index
    %16 = vector.load %arg4[%c0_8, %c0_9] : memref<384x128xf32, #tpu.memory_space<vmem>>, vector<384x128xf32>
    %cst_10 = arith.constant dense<0.000000e+00> : vector<8x128xf32>
    %17 = tpu.matmul %15, %16, %cst_10 {dimension_numbers = #tpu.dot_dimension_numbers<[1], [0], [0], [1], [0, 0, 1, 1], [], []>} : vector<8x384xf32>, vector<384x128xf32>, vector<8x128xf32> -> vector<8x128xf32>
    %c0_11 = arith.constant 0 : index
    %c0_12 = arith.constant 0 : index
    %18 = vector.load %arg5[%c0_11, %c0_12] : memref<1x128xf32, #tpu.memory_space<vmem>>, vector<1x128xf32>
    %19 = vector.broadcast %18 : vector<1x128xf32> to vector<8x128xf32>
    %20 = arith.addf %17, %19 : vector<8x128xf32>
    %c0_13 = arith.constant 0 : index
    %c0_14 = arith.constant 0 : index
    %21 = vector.load %arg6[%c0_13, %c0_14] : memref<8x128xf32, #tpu.memory_space<vmem>>, vector<8x128xf32>
    tpu.vector_store %arg6[%c0_13, %c0_14], %20 {strides = array<i32>} : memref<8x128xf32, #tpu.memory_space<vmem>>, vector<8x128xf32>,
    return
  }
  func.func @transform_0(%arg0: i32) -> (i32, i32) {
    %c0_i32 = arith.constant 0 : i32
    %c0_i32_0 = arith.constant 0 : i32
    return %arg0, %c0_i32 : i32, i32
  }
  func.func @transform_1(%arg0: i32) -> (i32, i32) {
    %c0_i32 = arith.constant 0 : i32
    %c0_i32_0 = arith.constant 0 : i32
    %c0_i32_1 = arith.constant 0 : i32
    return %c0_i32, %c0_i32_0 : i32, i32
  }
  func.func @transform_2(%arg0: i32) -> (i32, i32) {
    %c0_i32 = arith.constant 0 : i32
    %c0_i32_0 = arith.constant 0 : i32
    %c0_i32_1 = arith.constant 0 : i32
    return %c0_i32, %c0_i32_0 : i32, i32
  }
  func.func @transform_3(%arg0: i32) -> (i32, i32) {
    %c0_i32 = arith.constant 0 : i32
    %c0_i32_0 = arith.constant 0 : i32
    %c0_i32_1 = arith.constant 0 : i32
    return %c0_i32, %c0_i32_0 : i32, i32
  }
  func.func @transform_4(%arg0: i32) -> (i32, i32) {
    %c0_i32 = arith.constant 0 : i32
    %c0_i32_0 = arith.constant 0 : i32
    %c0_i32_1 = arith.constant 0 : i32
    return %c0_i32, %c0_i32_0 : i32, i32
  }
  func.func @transform_5(%arg0: i32) -> (i32, i32) {
    %c0_i32 = arith.constant 0 : i32
    %c0_i32_0 = arith.constant 0 : i32
    return %arg0, %c0_i32 : i32, i32
  }
}

</mosaic_0001>

<bundles_post_ra>
// kernel: net_forward.1
= control target key start
LH: loop header
LB: loop body
LE: loop exit
PB: predicated region body
PF: predicated region fallthrough
CT: control target
= control target key end

     0   :  { %v392_v0 = vmov 0   ;;  %v393_v2 = vmov 0.0   ;;  %v394_v12 = vmov 1   ;;  %vm395_vm0 = vmmov 0   ;;  %s605_s0 = inlined_call_operand.vmem [shape: f32[8,2], index: 0, kind: input, shape index: {}]   ;;  %s606_s3 = inlined_call_operand.vmem [shape: f32[384,128], index: 3, kind: input, shape index: {}]   ;;  %s607_s1 = inlined_call_operand.vmem [shape: f32[2,384], index: 1, kind: input, shape index: {}]   ;;  %s608_s2 = inlined_call_operand.vmem [shape: f32[1,384], index: 2, kind: input, shape index: {}]   ;;  %s609_s4 = inlined_call_operand.vmem [shape: f32[1,128], index: 4, kind: input, shape index: {}]   ;;  %s610_s5 = inlined_call_operand.vmem [shape: f32[8,128], index: 5, kind: output, shape index: {}]  }
   0x1   :  { %390 = vset.pattern.permute.xlu0 %v392_v0  ;;  %v20_v1 = vld [vmem:[%s605_s0] sm:$0xff]  ;;  %351 = vmatprep.subr.mxu1 %v393_v2  ;;  %v128_v3 = vld [vmem:[%s606_s3 + $0xf8] sm:$0xff]  ;;  %v127_v6 = vld [vmem:[%s606_s3 + $0xf0] sm:$0xff]  ;;  %v28_v52 = vlaneseq }
   0x2   :  { %v144_v4 = vld [vmem:[%s606_s3 + $0x178] sm:$0xff]  ;;  %24 = vperm.xlu0 %390, %v20_v1   ;;  %299 = vmatprep.subr.mxu0 %v128_v3  ;;  %v143_v7 = vld [vmem:[%s606_s3 + $0x170] sm:$0xff]  ;;  %v126_v9 = vld [vmem:[%s606_s3 + $0xe8] sm:$0xff] }
   0x3   :  { %v112_v5 = vld [vmem:[%s606_s3 + $0x78] sm:$0xff]  ;;  %352 = vmatpush3.msra.mxu1 %v144_v4  ;;  %v111_v8 = vld [vmem:[%s606_s3 + $0x70] sm:$0xff]  ;;  %v142_v10 = vld [vmem:[%s606_s3 + $0x168] sm:$0xff]  ;;  %383 = vmatprep.mubr.msk.f32.mxu1 %vm395_vm0, %v393_v2  ;;  %v29_v53 = vshrl.u32 %v28_v52, 7 }
   0x4   :  { %300 = vmatpush3.msra.mxu0 %v112_v5  ;;  %353 = vmatprep.subr.mxu1 %v393_v2  ;;  %v110_v11 = vld [vmem:[%s606_s3 + $0x68] sm:$0xff]  ;;  %v125_v13 = vld [vmem:[%s606_s3 + $0xe0] sm:$0xff]  ;;  %v124_v16 = vld [vmem:[%s606_s3 + $0xd8] sm:$0xff] }
   0x5   :  { %301 = vmatprep.subr.mxu0 %v127_v6  ;;  %354 = vmatpush3.msra.mxu1 %v143_v7  ;;  %v141_v14 = vld [vmem:[%s606_s3 + $0x160] sm:$0xff]  ;;  %v140_v17 = vld [vmem:[%s606_s3 + $0x158] sm:$0xff]  ;;  %v123_v19 = vld [vmem:[%s606_s3 + $0xd0] sm:$0xff]  ;;  %v30_v54 = vsub.s32 0, %v29_v53  ;;  %v34_v55 = vsub.s32 1, %v29_v53  ;;  %v38_v57 = vsub.s32 2, %v29_v53 }
   0x6   :  { %302 = vmatpush3.msra.mxu0 %v111_v8  ;;  %391 = vset.pattern.permute.xlu0 %v394_v12  ;;  %v109_v15 = vld [vmem:[%s606_s3 + $0x60] sm:$0xff]  ;;  %v108_v18 = vld [vmem:[%s606_s3 + $0x58] sm:$0xff]  ;;  %v139_v20 = vld [vmem:[%s606_s3 + $0x150] sm:$0xff] }
   0x7   :  { %355 = vmatprep.subr.mxu1 %v393_v2  ;;  %49 = vperm.xlu0 %391, %v20_v1   ;;  %v107_v21 = vld [vmem:[%s606_s3 + $0x50] sm:$0xff]  ;;  %v122_v22 = vld [vmem:[%s606_s3 + $0xc8] sm:$0xff]  ;;  %v121_v25 = vld [vmem:[%s606_s3 + $0xc0] sm:$0xff] }
   0x8   :  { %303 = vmatprep.subr.mxu0 %v126_v9  ;;  %356 = vmatpush3.msra.mxu1 %v142_v10  ;;  %v138_v23 = vld [vmem:[%s606_s3 + $0x148] sm:$0xff]  ;;  %v137_v26 = vld [vmem:[%s606_s3 + $0x140] sm:$0xff]  ;;  %v120_v28 = vld [vmem:[%s606_s3 + $0xb8] sm:$0xff] }
   0x9   :  { %304 = vmatpush3.msra.mxu0 %v110_v11  ;;  %357 = vmatprep.subr.mxu1 %v393_v2  ;;  %v106_v24 = vld [vmem:[%s606_s3 + $0x48] sm:$0xff]  ;;  %v105_v27 = vld [vmem:[%s606_s3 + $0x40] sm:$0xff]  ;;  %v136_v29 = vld [vmem:[%s606_s3 + $0x138] sm:$0xff] }
   0xa   :  { %305 = vmatprep.subr.mxu0 %v125_v13  ;;  %358 = vmatpush3.msra.mxu1 %v141_v14  ;;  %v104_v30 = vld [vmem:[%s606_s3 + $0x38] sm:$0xff]  ;;  %v119_v31 = vld [vmem:[%s606_s3 + $0xb0] sm:$0xff]  ;;  %v118_v34 = vld [vmem:[%s606_s3 + $0xa8] sm:$0xff] }
   0xb   :  { %306 = vmatpush3.msra.mxu0 %v109_v15  ;;  %359 = vmatprep.subr.mxu1 %v393_v2  ;;  %v135_v32 = vld [vmem:[%s606_s3 + $0x130] sm:$0xff]  ;;  %v134_v35 = vld [vmem:[%s606_s3 + $0x128] sm:$0xff]  ;;  %v117_v37 = vld [vmem:[%s606_s3 + $0xa0] sm:$0xff] }
   0xc   :  { %307 = vmatprep.subr.mxu0 %v124_v16  ;;  %360 = vmatpush3.msra.mxu1 %v140_v17  ;;  %v103_v33 = vld [vmem:[%s606_s3 + $0x30] sm:$0xff]  ;;  %v102_v36 = vld [vmem:[%s606_s3 + $0x28] sm:$0xff]  ;;  %v133_v38 = vld [vmem:[%s606_s3 + $0x120] sm:$0xff] }
   0xd   :  { %308 = vmatpush3.msra.mxu0 %v108_v18  ;;  %361 = vmatprep.subr.mxu1 %v393_v2  ;;  %v101_v39 = vld [vmem:[%s606_s3 + $0x20] sm:$0xff]  ;;  %v116_v40 = vld [vmem:[%s606_s3 + $0x98] sm:$0xff]  ;;  %v115_v43 = vld [vmem:[%s606_s3 + $0x90] sm:$0xff] }
   0xe   :  { %309 = vmatprep.subr.mxu0 %v123_v19  ;;  %362 = vmatpush3.msra.mxu1 %v139_v20  ;;  %v132_v41 = vld [vmem:[%s606_s3 + $0x118] sm:$0xff]  ;;  %v131_v44 = vld [vmem:[%s606_s3 + $0x110] sm:$0xff]  ;;  %v114_v46 = vld [vmem:[%s606_s3 + $0x88] sm:$0xff] }
   0xf   :  { %310 = vmatpush3.msra.mxu0 %v107_v21  ;;  %363 = vmatprep.subr.mxu1 %v393_v2  ;;  %v100_v42 = vld [vmem:[%s606_s3 + $0x18] sm:$0xff]  ;;  %v99_v45 = vld [vmem:[%s606_s3 + $0x10] sm:$0xff]  ;;  %v130_v47 = vld [vmem:[%s606_s3 + $0x108] sm:$0xff] }
  0x10   :  { %311 = vmatprep.subr.mxu0 %v122_v22  ;;  %364 = vmatpush3.msra.mxu1 %v138_v23  ;;  %v98_v48 = vld [vmem:[%s606_s3 + $0x8] sm:$0xff]  ;;  %v113_v49 = vld [vmem:[%s606_s3 + $0x80] sm:$0xff] }
  0x11   :  { %312 = vmatpush3.msra.mxu0 %v106_v24  ;;  %365 = vmatprep.subr.mxu1 %v393_v2  ;;  %v129_v50 = vld [vmem:[%s606_s3 + $0x100] sm:$0xff] }
  0x12   :  { %313 = vmatprep.subr.mxu0 %v121_v25  ;;  %366 = vmatpush3.msra.mxu1 %v137_v26  ;;  %v97_v51 = vld [vmem:[%s606_s3] sm:$0xff] }
  0x13   :  { %314 = vmatpush3.msra.mxu0 %v105_v27  ;;  %367 = vmatprep.subr.mxu1 %v393_v2  ;;  %v21_v56 = vld [vmem:[%s607_s1] ss:$2 sm:$0x7]  ;;  %v297_v58 = vld [vmem:[%s607_s1 + $0x1] ss:$2 sm:$0x7] }
  0x14   :  { %315 = vmatprep.subr.mxu0 %v120_v28  ;;  %368 = vmatpush3.msra.mxu1 %v136_v29  ;;  %v31_v60 = vrot.slane %v21_v56, %v30_v54  ;;  %v35_v61 = vrot.slane %v21_v56, %v34_v55  ;;  %v74_v62 = vld [vmem:[%s608_s2] sm:$0x7]  ;;  %v39_v63 = vrot.slane %v21_v56, %v38_v57 }
  0x15   :  { %316 = vmatpush3.msra.mxu0 %v104_v30  ;;  %369 = vmatprep.subr.mxu1 %v393_v2  ;;  %v56_v0 = vrot.slane %v297_v58, %v30_v54  ;;  %v60_v1 = vrot.slane %v297_v58, %v34_v55  ;;  %v83_v3 = vrot.slane %v74_v62, %v34_v55  ;;  %v298_v25 = vld [vmem:[%s609_s4] ss:$0 sm:$0xff] }
  0x16   :  { %317 = vmatprep.subr.mxu0 %v119_v31  ;;  %370 = vmatpush3.msra.mxu1 %v135_v32  ;;  %v87_v7 = vrot.slane %v74_v62, %v38_v57  ;;  %v79_v8 = vrot.slane %v74_v62, %v30_v54 }
  0x17   :  { %318 = vmatpush3.msra.mxu0 %v103_v33  ;;  %371 = vmatprep.subr.mxu1 %v393_v2 }
  0x18   :  { %319 = vmatprep.subr.mxu0 %v118_v34  ;;  %372 = vmatpush3.msra.mxu1 %v134_v35 }
  0x19   :  { %320 = vmatpush3.msra.mxu0 %v102_v36  ;;  %373 = vmatprep.subr.mxu1 %v393_v2 }
  0x1a   :  { %321 = vmatprep.subr.mxu0 %v117_v37  ;;  %374 = vmatpush3.msra.mxu1 %v133_v38 }
  0x1b   :  { %322 = vmatpush3.msra.mxu0 %v101_v39  ;;  %375 = vmatprep.subr.mxu1 %v393_v2 }
  0x1c   :  { %323 = vmatprep.subr.mxu0 %v116_v40  ;;  %376 = vmatpush3.msra.mxu1 %v132_v41 }
  0x1d   :  { %324 = vmatpush3.msra.mxu0 %v100_v42  ;;  %377 = vmatprep.subr.mxu1 %v393_v2 }
  0x1e   :  { %325 = vmatprep.subr.mxu0 %v115_v43  ;;  %378 = vmatpush3.msra.mxu1 %v131_v44 }
  0x1f   :  { %326 = vmatpush3.msra.mxu0 %v99_v45  ;;  %379 = vmatprep.subr.mxu1 %v393_v2 }
  0x20   :  { %327 = vmatprep.subr.mxu0 %v114_v46  ;;  %380 = vmatpush3.msra.mxu1 %v130_v47 }
  0x21   :  { %328 = vmatpush3.msra.mxu0 %v98_v48  ;;  %381 = vmatprep.subr.mxu1 %v393_v2  ;;  %v64_v2 = vrot.slane %v297_v58, %v38_v57 }
  0x22   :  { %329 = vmatprep.subr.mxu0 %v113_v49  ;;  %382 = vmatpush3.msra.mxu1 %v129_v50 }
  0x23   :  { %330 = vmatpush3.msra.mxu0 %v97_v51 }
  0x7d   :  { %v25_v59 = vpop.permute.xlu0 %24 }
  0x7e   :  { %v43_v4 = vmul.f32 %v31_v60, %v25_v59  ;;  %v44_v5 = vmul.f32 %v35_v61, %v25_v59  ;;  %v45_v9 = vmul.f32 %v39_v63, %v25_v59 }
  0x82   :  { %v50_v6 = vpop.permute.xlu0 %49 }
  0x83   :  { %v68_v10 = vmul.f32 %v56_v0, %v50_v6  ;;  %v69_v11 = vmul.f32 %v60_v1, %v50_v6  ;;  %v70_v12 = vmul.f32 %v64_v2, %v50_v6 }
  0x85   :  { %v71_v13 = vadd.f32 %v68_v10, %v43_v4  ;;  %v73_v14 = vadd.f32 %v70_v12, %v45_v9  ;;  %v72_v15 = vadd.f32 %v69_v11, %v44_v5 }
  0x87   :  { %v92_v16 = vadd.f32 %v83_v3, %v72_v15  ;;  %v93_v17 = vadd.f32 %v87_v7, %v73_v14  ;;  %v91_v18 = vadd.f32 %v79_v8, %v71_v13 }
  0x89   :  { %v95_v19 = vmax.f32 %v92_v16, 0.0  ;;  %v96_v20 = vmax.f32 %v93_v17, 0.0  ;;  %v94_v21 = vmax.f32 %v91_v18, 0.0 }
  0x8b   :  { %216 = vmatprep.mubr.f32.mxu0 %v95_v19  ;;  %384 = vmatmul.mubr.f32.vlgmr.msra.gmra.mxu1 %v96_v20 }
  0x8c   :  { %217 = vmatmul.mubr.f32.vlgmr.msra.gmra.mxu0 %v94_v21 }
 0x14b   :  { %v288_v22 = vpop.f32.mrf.mxu1 }
 0x14c   :  { %v331_v23 = vpop.f32.mrf.mxu0 }
 0x14d   :  { %v385_v24 = vpop.f32.mrf.mxu1 }
 0x14e   :  { %v332_v26 = vpop.f32.mrf.mxu0 }
 0x14f   :  { %v333_v27 = vadd.f32 %v332_v26, %v331_v23 }
 0x151   :  { %v219_v28 = vadd.f32 %v333_v27, %v298_v25 }
 0x153   :  { %v289_v29 = vadd.f32 %v288_v22, %v219_v28 }
 0x155   :  { %292 = vst [vmem:[%s610_s5] sm:$0xff] %v289_v29 }

</bundles_post_ra>
